<compile_context>
chip_gen: v7x
topology: tpu7x:2x2x1
jax: 0.10.0
libtpu: 0.0.40
codegen_flags: <defaults>
</compile_context>

<pallas_src>
import numpy as np
import jax
import jax.numpy as jnp
from jax.experimental import pallas as pl
from jax.experimental.pallas import tpu as pltpu

HIDDEN = 768          # fixed by nn.Linear(768, tagset_size) in the module
TAGSET_SIZE = 17
T = 8                 # subword tokens per sentence (after stripping CLS/SEP)
BATCH = 32            # sentences per forward call
GROUP_SIZE = 16       # sentences packed per grid step -> 128-row MXU blocks


# ----------------------------- Pallas kernel -------------------------------
def tagger_kernel(a_ref, e_ref, w_ref, b_ref, o_ref):
    # pooled word embeddings: [M, K]bf16 @ [K, H]bf16 -> [M, H]f32 (MXU, f32 acc)
    pooled = jnp.dot(a_ref[...], e_ref[...], preferred_element_type=jnp.float32)
    # tag space: [M, H]bf16 @ [H, C]bf16 -> [M, C]f32 (MXU, f32 acc)
    tags = jnp.dot(pooled.astype(jnp.bfloat16), w_ref[...],
                   preferred_element_type=jnp.float32)
    # bias add in f32 (v5e VPU has no bf16 ALU)
    o_ref[...] = tags + b_ref[...]


def run_tagger(a2d, e2d, w_p, b_p, *, num_groups, group_m, group_k):
    """a2d: [num_groups*group_m, group_k] bf16 (block-diag per sentence group)
       e2d: [num_groups*group_k, H]       bf16 (padded tokens, group-major)
       w_p: [H, C_p] bf16, b_p: [1, C_p] f32 (padded once at load time)."""
    H = e2d.shape[1]
    c_p = w_p.shape[1]
    return pl.pallas_call(
        tagger_kernel,
        out_shape=jax.ShapeDtypeStruct((num_groups * group_m, c_p), jnp.float32),
        grid=(num_groups,),
        in_specs=[
            pl.BlockSpec((group_m, group_k), lambda g: (g, 0)),  # streamed A
            pl.BlockSpec((group_k, H), lambda g: (g, 0)),        # streamed E
            pl.BlockSpec((H, c_p), lambda g: (0, 0)),            # resident W
            pl.BlockSpec((1, c_p), lambda g: (0, 0)),            # resident bias
        ],
        out_specs=pl.BlockSpec((group_m, c_p), lambda g: (g, 0)),
        compiler_params=pltpu.CompilerParams(
            dimension_semantics=("parallel",)),  # 2 TCs/chip on v7x split groups
    )(a2d, e2d, w_p, b_p)


# ------------------------- plain-Python glue --------------------------------
def build_assignment(word_ids, wn_pad, t_pad):
    """Exact replica of the subword->word pooling loop in embed_sentence(),
    emitted directly at padded shape [wn_pad, t_pad] (no device-side pad)."""
    n_tok = len(word_ids)
    A = np.zeros((wn_pad, t_pad), np.float32)
    row = 0
    tmp_idx = []
    for i in range(n_tok):
        if i + 1 < n_tok and word_ids[i] == word_ids[i + 1]:
            tmp_idx.append(i)
        elif len(tmp_idx) > 0:
            A[row, tmp_idx] = 1.0 / len(tmp_idx)  # mean of accumulated subwords
            tmp_idx = []
            row += 1
        else:
            A[row, i] = 1.0                       # single-token word
            row += 1
    return A, row                                 # row == number of real words


def make_word_ids(n_tokens, seed):
    """Deterministic fake tokenizer word_ids: words span 1..3 subwords."""
    rng = np.random.RandomState(seed)
    ids, w = [], 0
    while len(ids) < n_tokens:
        span = int(rng.randint(1, 4))
        ids.extend([w] * min(span, n_tokens - len(ids)))
        w += 1
    return ids


# ------------------------------ main ----------------------------------------
if __name__ == "__main__":
    # TODO(synk): BertModel.from_pretrained / the HuggingFace tokenizer have no
    # Pallas equivalent; mBERT last_hidden_state (CLS/SEP stripped) and the
    # word_ids are synthesized deterministically instead.
    assert BATCH % GROUP_SIZE == 0
    wn_p = -(-T // 8) * 8            # padded word slots per sentence (sublane)
    t_p = -(-T // 8) * 8             # padded tokens per sentence (sublane)
    c_p = -(-TAGSET_SIZE // 128) * 128  # lane-dense output width
    group_m = GROUP_SIZE * wn_p      # 128 rows fed to the MXU per grid step
    group_k = GROUP_SIZE * t_p       # 128-wide contraction for the pooling
    num_groups = BATCH // GROUP_SIZE

    key = jax.random.PRNGKey(0)
    k_emb, k_w, k_b = jax.random.split(key, 3)

    # synthetic mBERT token embeddings: [B, T, 768]
    token_embeddings = jax.random.normal(k_emb, (BATCH, T, HIDDEN), dtype=jnp.float32)
    # nn.Linear(768, tagset): weight [tagset, 768], bias [tagset]
    w_linear = jax.random.normal(k_w, (TAGSET_SIZE, HIDDEN), dtype=jnp.float32) * 0.02
    b_linear = jax.random.normal(k_b, (TAGSET_SIZE,), dtype=jnp.float32) * 0.02

    # ---- load-time prep (hoisted out of the per-call path) ------------------
    w_p = jnp.zeros((HIDDEN, c_p), jnp.bfloat16).at[:, :TAGSET_SIZE].set(
        w_linear.T.astype(jnp.bfloat16))
    b_p = jnp.zeros((1, c_p), jnp.float32).at[:, :TAGSET_SIZE].set(b_linear[None, :])

    # ---- per-batch glue: assignment matrices + packed operands --------------
    # TODO(synk): for truly ragged sentences, scalar-prefetch per-sentence
    # lengths (pltpu.PrefetchScalarGridSpec) instead of padding to a global T.
    word_ids = [make_word_ids(T, 1234 + s) for s in range(BATCH)]
    a_list, n_words = [], []
    for s in range(BATCH):
        A_s, wn_s = build_assignment(word_ids[s], wn_p, t_p)
        a_list.append(A_s)
        n_words.append(wn_s)

    # block-diagonal packing: GROUP_SIZE sentences per grid step
    a2d_np = np.zeros((num_groups * group_m, group_k), np.float32)
    for s, A_s in enumerate(a_list):
        g, j = divmod(s, GROUP_SIZE)
        r0 = g * group_m + j * wn_p
        a2d_np[r0:r0 + wn_p, j * t_p:j * t_p + t_p] = A_s
    a2d = jnp.asarray(a2d_np, dtype=jnp.bfloat16)

    # pad tokens to t_p and flatten group-major: [B*t_p, 768] bf16
    e_pad = jnp.zeros((BATCH, t_p, HIDDEN), jnp.float32).at[:, :T, :].set(
        token_embeddings)
    e2d = e_pad.reshape(BATCH * t_p, HIDDEN).astype(jnp.bfloat16)

    out = run_tagger(a2d, e2d, w_p, b_p,
                     num_groups=num_groups, group_m=group_m, group_k=group_k)
    out = jax.block_until_ready(out)

    # ---- reference check (f32 numpy, exact reference-loop semantics) --------
    e_np = np.asarray(token_embeddings)
    w_np = np.asarray(w_linear).T
    b_np = np.asarray(b_linear)
    out_np = np.asarray(out)
    for s in range(BATCH):
        wn_s = n_words[s]
        ref = (a_list[s][:wn_s, :T] @ e_np[s]) @ w_np + b_np
        got = out_np[s * wn_p:s * wn_p + wn_s, :TAGSET_SIZE]
        assert got.shape == (wn_s, TAGSET_SIZE)
        # bf16 matmuls with f32 accumulation -> loosened tolerance vs f32 ref
        np.testing.assert_allclose(got, ref, rtol=3e-2, atol=3e-2)

    print("KERNEL_OK")
</pallas_src>

<mosaic_0001>
module attributes {stable_mosaic.version = 11 : i64} {
  func.func @tagger_kernel(%arg0: i32, %arg1: memref<128x128xbf16, #tpu.memory_space<vmem>>, %arg2: memref<128x768xbf16, #tpu.memory_space<vmem>>, %arg3: memref<768x128xbf16, #tpu.memory_space<vmem>>, %arg4: memref<1x128xf32, #tpu.memory_space<vmem>>, %arg5: memref<128x128xf32, #tpu.memory_space<vmem>>) attributes {dimension_semantics = [#tpu.dimension_semantics<parallel>], iteration_bounds = array<i64: 2>, scalar_prefetch = 0 : i64, scratch_operands = 0 : i64, tpu.core_type = #tpu.core_type<tc>, window_params = [{transform_indices = @transform_0, window_bounds = array<i64: 128, 128>}, {transform_indices = @transform_1, window_bounds = array<i64: 128, 768>}, {pipeline_mode = #tpu.pipeline_mode<synchronous>, transform_indices = @transform_2, window_bounds = array<i64: 768, 128>}, {pipeline_mode = #tpu.pipeline_mode<synchronous>, transform_indices = @transform_3, window_bounds = array<i64: 1, 128>}, {transform_indices = @transform_4, window_bounds = array<i64: 128, 128>}]} {
    %c0 = arith.constant 0 : index
    %c0_0 = arith.constant 0 : index
    %0 = vector.load %arg1[%c0, %c0_0] : memref<128x128xbf16, #tpu.memory_space<vmem>>, vector<128x128xbf16>
    %c0_1 = arith.constant 0 : index
    %c0_2 = arith.constant 0 : index
    %1 = vector.load %arg2[%c0_1, %c0_2] : memref<128x768xbf16, #tpu.memory_space<vmem>>, vector<128x768xbf16>
    %cst = arith.constant dense<0.000000e+00> : vector<128x768xf32>
    %2 = tpu.matmul %0, %1, %cst {dimension_numbers = #tpu.dot_dimension_numbers<[1], [0], [0], [1], [0, 0, 1, 1], [], []>} : vector<128x128xbf16>, vector<128x768xbf16>, vector<128x768xf32> -> vector<128x768xf32>
    %3 = arith.truncf %2 : vector<128x768xf32> to vector<128x768xbf16>
    %c0_3 = arith.constant 0 : index
    %c0_4 = arith.constant 0 : index
    %4 = vector.load %arg3[%c0_3, %c0_4] : memref<768x128xbf16, #tpu.memory_space<vmem>>, vector<768x128xbf16>
    %cst_5 = arith.constant dense<0.000000e+00> : vector<128x128xf32>
    %5 = tpu.matmul %3, %4, %cst_5 {dimension_numbers = #tpu.dot_dimension_numbers<[1], [0], [0], [1], [0, 0, 1, 1], [], []>} : vector<128x768xbf16>, vector<768x128xbf16>, vector<128x128xf32> -> vector<128x128xf32>
    %c0_6 = arith.constant 0 : index
    %c0_7 = arith.constant 0 : index
    %6 = vector.load %arg4[%c0_6, %c0_7] : memref<1x128xf32, #tpu.memory_space<vmem>>, vector<1x128xf32>
    %7 = vector.broadcast %6 : vector<1x128xf32> to vector<128x128xf32>
    %8 = arith.addf %5, %7 : vector<128x128xf32>
    %c0_8 = arith.constant 0 : index
    %c0_9 = arith.constant 0 : index
    %9 = vector.load %arg5[%c0_8, %c0_9] : memref<128x128xf32, #tpu.memory_space<vmem>>, vector<128x128xf32>
    tpu.vector_store %arg5[%c0_8, %c0_9], %8 {strides = array<i32>} : memref<128x128xf32, #tpu.memory_space<vmem>>, vector<128x128xf32>,
    return
  }
  func.func @transform_0(%arg0: i32) -> (i32, i32) {
    %c0_i32 = arith.constant 0 : i32
    %c0_i32_0 = arith.constant 0 : i32
    return %arg0, %c0_i32 : i32, i32
  }
  func.func @transform_1(%arg0: i32) -> (i32, i32) {
    %c0_i32 = arith.constant 0 : i32
    %c0_i32_0 = arith.constant 0 : i32
    return %arg0, %c0_i32 : i32, i32
  }
  func.func @transform_2(%arg0: i32) -> (i32, i32) {
    %c0_i32 = arith.constant 0 : i32
    %c0_i32_0 = arith.constant 0 : i32
    %c0_i32_1 = arith.constant 0 : i32
    return %c0_i32, %c0_i32_0 : i32, i32
  }
  func.func @transform_3(%arg0: i32) -> (i32, i32) {
    %c0_i32 = arith.constant 0 : i32
    %c0_i32_0 = arith.constant 0 : i32
    %c0_i32_1 = arith.constant 0 : i32
    return %c0_i32, %c0_i32_0 : i32, i32
  }
  func.func @transform_4(%arg0: i32) -> (i32, i32) {
    %c0_i32 = arith.constant 0 : i32
    %c0_i32_0 = arith.constant 0 : i32
    return %arg0, %c0_i32 : i32, i32
  }
}

</mosaic_0001>

<bundles_post_ra>
// kernel: tpu_custom_call.1
= control target key start
LH: loop header
LB: loop body
LE: loop exit
PB: predicated region body
PF: predicated region fallthrough
CT: control target
= control target key end

     0   :  { %s3001_s0 = inlined_call_operand.hbm [shape: bf16[256,128], index: 0, kind: input, shape index: {}]   ;;  %s3002_s1 = inlined_call_operand.hbm [shape: bf16[256,768], index: 1, kind: input, shape index: {}]   ;;  %s3003_s2 = inlined_call_operand.hbm [shape: bf16[768,128], index: 2, kind: input, shape index: {}]   ;;  %s3004_s3 = inlined_call_operand.vmem [shape: f32[1,128], index: 3, kind: input, shape index: {}]   ;;  %s3005_s4 = inlined_call_operand.hbm [shape: f32[256,128], index: 4, kind: output, shape index: {}]  }
   0x1   :  { %3009 = sst [smem:[#allocation13_spill]] %s3001_s0 }
   0x2   :  { %3010 = sst [smem:[#allocation14_spill]] %s3003_s2 }
   0x3   :  { %9 = vsyncpa [#allocation3], 0 }
   0x4   :  { %11 = vsyncpa [#allocation3 + $0x1], 0 }
   0x5   :  { %12 = vsyncpa [#allocation6], 0 }
   0x6   :  { %14 = vsyncpa [#allocation6 + $0x1], 0 }
   0x7   :  { %15 = vsyncpa [#allocation4], 0 }
   0x8   :  { %17 = vsyncpa [#allocation4 + $0x1], 0  ;;  %s2549_s15 = smov 0   ;;  %s2551_s16 = smov 0  }
   0x9   :  { %s2553_s17 = smov 0   ;;  %s2555_s18 = smov 0  }
   0xa LB: > { %s2570_s19 = sadd.s32 4294967295, %s2511_s18   ;;  %s1831_s20 = sadd.s32 4294967294, %s2511_s18   ;;  %s2511_s18 = sphi %s2555_s18, %s3029_s18   ;;  %s2507_s17 = sphi %s2553_s17, %s3028_s17   ;;  %s2503_s16 = sphi %s2551_s16, %s3027_s16   ;;  %s2499_s15 = sphi %s2549_s15, %s3026_s15  }
   0xb   : > { %p43_p0 = scmp.ne.s32.totalorder %s2503_s16, %s2499_s15  ;;  %p3006_p1 = scmp.eq.s32.totalorder %s2570_s19, 0 }
   0xc   : > { %p141_p3 = scmp.eq.s32.totalorder %s1831_s20, 1  ;;  %p1832_p5 = scmp.ge.s32.totalorder %s2511_s18, 1 }
   0xd   : > { %p2579_p4 = por %p3006_p1, %p43_p0  ;;  %p148_p7 = scmp.lt.s32.totalorder %s2511_s18, 3 }
   0xe   : > { %p2584_p6 = por %p141_p3, %p43_p0  ;;  %s2513_s24 = smov [#allocation7]  }
   0xf   : > { %s3011_s21 = scalar_select %p2579_p4, 1, 0 }
  0x10   : > { %s3012_s22 = scalar_select %p2584_p6, 1, 0 }
  0x11   : > { %p2589_p8 = pnand %p1832_p5, %p148_p7  ;;  %s160_s25 = sshll.u32 %s2513_s24, 4  ;;  %s2593_s25 = int_to_ptr.vmem [resolvable:$true] %s160_s25 }
  0x12   : > { %s2605_s27 = sadd.s32 1, %s2511_s18   ;;  %s30_s28 = sadd.s32 1, %s2507_s17 }
  0x13   : > { %s3013_s23 = scalar_select %p2589_p8, 1, 0 }
  0x14   : > { %p2162_p9 = pneg %p2589_p8  ;;  %s27_s29 = ssub.s32 %s2511_s18, %s2605_s27 }
  0x15   : > { %s3015_s2 = sld [smem:[#allocation14_spill]] }
  0x16   : > { %p2600_p11 = pnand %p2162_p9, %p3006_p1 }
  0x18   : > { %p2351_p13 = pneg %p2600_p11 }
  0x1b   : > { %s2349_s6 = scalar_lea.hbm %s3015_s2, 6144 }
  0x1c   : > { %p2350_p12 = scmp.ne.s32.totalorder %s3015_s2, %s2349_s6  ;;  %p2356_p5 = scmp.lt.u32.totalorder %s2349_s6, %s3015_s2 }
  0x1e   : > { %p2352_p0 = pnand %p2351_p13, %p2350_p12 }
  0x20   : > { %p2353_p3 = pneg %p2352_p0 }
  0x22   : > { %p2358_p7 = pnand %p2356_p5, %p2353_p3 }
  0x24   : > { %2361 = shalt.err (!%p2358_p7)
}
  0x25   : > { %s2362_s11 = scalar_lea.vmem %s2593_s25, 6144  ;;  %p2370_p2 = scmp.lt.s32.totalorder %s2593_s25, %s2593_s25 }
  0x26   : > { %p2363_p9 = scmp.ne.s32.totalorder %s2593_s25, %s2362_s11  ;;  %p2371_p6 = scmp.lt.s32.totalorder %s2362_s11, %s2362_s11 }
  0x28   : > { %p2365_p10 = pnand %p2363_p9, %p2351_p13  ;;  %p2372_p4 = por %p2371_p6, %p2370_p2 }
  0x2a   : > { %p2366_p1 = pneg %p2365_p10 }
  0x2c   : > { %p2373_p8 = pnand %p2372_p4, %p2366_p1 }
  0x2e   : > { %2376 = shalt.err (!%p2373_p8)
}
  0x2f   : > { %s2514_s12 = smov 64   ;;  %s2515_s13 = smov 4  }
  0x30   : > { %2165 = dma.hbm_to_vmem [thread:$0]  (!%p2600_p11), %s3015_s2, 6144, %s2593_s25, [#allocation6], %s2514_s12, %s2514_s12, %s2515_s13  }
  0x31   : > { %p28_p1 = scmp.eq.s32.totalorder %s27_s29, 0  ;;  %p37_p2 = scmp.ne.s32.totalorder %s2507_s17, %s2503_s16 }
  0x32   : > { %p38_p4 = scmp.eq.s32.totalorder %s2511_s18, 0  ;;  %p2178_p6 = scmp.lt.s32.totalorder %s2511_s18, 2 }
  0x33   : > { %s2639_s24 = scalar_select %p28_p1, %s2507_s17, %s30_s28  }
  0x34   : > { %p39_p8 = por %p38_p4, %p37_p2  ;;  %p3016_p10 = scmp.eq.s32.totalorder %s2570_s19, 1 }
  0x35   : > { %s2648_s26 = sand.u32 1, %s2507_s17   ;;  %s1955_s5 = sshll.u32 %s2511_s18, 10 }
  0x36   : > { %p2643_p12 = por %p3016_p10, %p37_p2  ;;  %s1835_s6 = sshll.u32 %s2648_s26, 6 }
  0x37   : > { %s3018_s0 = sld [smem:[#allocation13_spill]]  ;;  %s181_s28 = scalar_lea.vmem [#allocation2], %s1835_s6 }
  0x38   : > { %s188_s8 = sshll.u32 %s181_s28, 4  ;;  %p2657_p11 = pnand %p2178_p6, %p39_p8  ;;  %s2661_s8 = int_to_ptr.vmem [resolvable:$true] %s188_s8 }
  0x39   : > { %s198_s10 = sand.u32 1, %s2511_s18   ;;  %s178_s11 = scalar_lea.sflag [#allocation3], %s2648_s26 }
  0x3a   : > { %p2379_p0 = pneg %p2657_p11 }
  0x3d   : > { %s2655_s29 = scalar_lea.hbm %s3018_s0, %s1955_s5  ;;  %s2382_s6 = scalar_lea.hbm %s3018_s0, 2048 }
  0x3e   : > { %s2377_s14 = scalar_lea.hbm %s2655_s29, 1024  ;;  %p2383_p7 = scmp.lt.u32.totalorder %s2655_s29, %s3018_s0 }
  0x3f   : > { %p2378_p13 = scmp.ne.s32.totalorder %s2655_s29, %s2377_s14  ;;  %p2384_p9 = scmp.lt.u32.totalorder %s2382_s6, %s2377_s14 }
  0x40   : > { %p2386_p2 = scmp.lt.u32.totalorder %s2377_s14, %s2655_s29 }
  0x41   : > { %p2380_p3 = pnand %p2379_p0, %p2378_p13  ;;  %p2385_p1 = por %p2384_p9, %p2383_p7 }
  0x43   : > { %p2381_p5 = pneg %p2380_p3  ;;  %p2387_p4 = por %p2386_p2, %p2385_p1 }
  0x45   : > { %p2388_p6 = pnand %p2387_p4, %p2381_p5 }
  0x47   : > { %2391 = shalt.err (!%p2388_p6)
}
  0x48   : > { %s2392_s28 = scalar_lea.vmem %s2661_s8, 1024  ;;  %s2516_s20 = smov [#allocation2]  }
  0x49   : > { %p2393_p8 = scmp.ne.s32.totalorder %s2661_s8, %s2392_s28  ;;  %s2397_s5 = sshll.u32 %s2516_s20, 4  ;;  %s2398_s5 = int_to_ptr.vmem [resolvable:$false] %s2397_s5 }
  0x4a   : > { %s2399_s25 = scalar_lea.vmem %s2398_s5, 2048  ;;  %p2400_p3 = scmp.lt.s32.totalorder %s2661_s8, %s2398_s5 }
  0x4b   : > { %p2395_p10 = pnand %p2393_p8, %p2379_p0  ;;  %p2401_p7 = scmp.lt.s32.totalorder %s2399_s25, %s2392_s28 }
  0x4d   : > { %p2396_p13 = pneg %p2395_p10  ;;  %p2402_p9 = por %p2401_p7, %p2400_p3 }
  0x4f   : > { %p2403_p1 = pnand %p2402_p9, %p2396_p13 }
  0x51   : > { %2406 = shalt.err (!%p2403_p1)
}
  0x52   : > { %2169 = dma.hbm_to_vmem [thread:$0]  (!%p2657_p11), %s2655_s29, 1024, %s2661_s8, %s178_s11, %s2514_s12, %s2514_s12, %s2515_s13  }
  0x53   : > { %s2149_s14 = smul.u32 384, %s2648_s26  ;;  %s2706_s0 = scalar_lea.sflag [#allocation6], %s198_s10 }
  0x54   : > { %s2150_s6 = smul.u32 6144, %s2511_s18  ;;  %s2412_s26 = scalar_lea.hbm %s3002_s1, 12288 }
  0x55   : > { %s202_s5 = scalar_lea.vmem [#allocation5], %s2149_s14 }
  0x56   : > { %s2700_s20 = scalar_lea.hbm %s3002_s1, %s2150_s6  ;;  %s210_s25 = sshll.u32 %s202_s5, 4  ;;  %s2702_s25 = int_to_ptr.vmem [resolvable:$true] %s210_s25 }
  0x57   : > { %s2407_s2 = scalar_lea.hbm %s2700_s20, 6144  ;;  %p2413_p6 = scmp.lt.u32.totalorder %s2700_s20, %s3002_s1 }
  0x58   : > { %p2408_p5 = scmp.ne.s32.totalorder %s2700_s20, %s2407_s2  ;;  %p2414_p8 = scmp.lt.u32.totalorder %s2412_s26, %s2407_s2 }
  0x59   : > { %p2416_p13 = scmp.lt.u32.totalorder %s2407_s2, %s2700_s20 }
  0x5a   : > { %p2410_p2 = pnand %p2408_p5, %p2379_p0  ;;  %p2415_p10 = por %p2414_p8, %p2413_p6 }
  0x5c   : > { %p2411_p4 = pneg %p2410_p2  ;;  %p2417_p3 = por %p2416_p13, %p2415_p10 }
  0x5e   : > { %p2418_p7 = pnand %p2417_p3, %p2411_p4 }
  0x60   : > { %2421 = shalt.err (!%p2418_p7)
}
  0x61   : > { %s2422_s10 = scalar_lea.vmem %s2702_s25, 6144  ;;  %s2517_s11 = smov [#allocation5]  }
  0x62   : > { %p2423_p9 = scmp.ne.s32.totalorder %s2702_s25, %s2422_s10  ;;  %s2427_s14 = sshll.u32 %s2517_s11, 4  ;;  %s2428_s14 = int_to_ptr.vmem [resolvable:$false] %s2427_s14 }
  0x63   : > { %s2429_s6 = scalar_lea.vmem %s2428_s14, 12288  ;;  %p2430_p2 = scmp.lt.s32.totalorder %s2702_s25, %s2428_s14 }
  0x64   : > { %p2425_p1 = pnand %p2423_p9, %p2379_p0  ;;  %p2431_p6 = scmp.lt.s32.totalorder %s2429_s6, %s2422_s10 }
  0x66   : > { %p2426_p5 = pneg %p2425_p1  ;;  %p2432_p8 = por %p2431_p6, %p2430_p2 }
  0x68   : > { %p2433_p10 = pnand %p2432_p8, %p2426_p5 }
  0x6a   : > { %2436 = shalt.err (!%p2433_p10)
}
  0x6b   : > { %s2518_s2 = smov 384   ;;  %s2519_s7 = smov 24  }
  0x6c   : > { %2172 = dma.hbm_to_vmem [thread:$0]  (!%p2657_p11), %s2700_s20, 6144, %s2702_s25, %s2706_s0, %s2518_s2, %s2518_s2, %s2519_s7  }
  0x6d   : > { %p3020_p0 = scmp.ne.s32.totalorder %s3013_s23, 0 }
  0x6e   : > { %s2735_s28 = sand.u32 (!%p3020_p0), 1, %s2503_s16   ;;  %p3021_p4 = scmp.ne.s32.totalorder (!%p3020_p0), %s3011_s21, 0 }
  0x6f   : > { %222 = sbr.rel (%p3020_p0) target bundleno = 732 (0x2dc), region = 36  ;;  %s1842_s5 = sshll.u32 (!%p3020_p0), %s2735_s28, 6 }
  0x70   : > { %s225_s12 = scalar_lea.sflag (!%p3020_p0), [#allocation3], %s2735_s28  ;;  %s2739_s13 = scalar_lea.vmem (!%p3020_p0), [#allocation2], %s1842_s5 }
  0x76   : > { %2482 = dma.done.wait (%p3021_p4), %s225_s12, 1024  }
  0x77   : > { %2484 = vsyncadd (%p3021_p4), %s225_s12, 4294966272  ;;  %s233_s0 = sand.u32 1, %s2570_s19   ;;  %s2151_s23 = smul.u32 384, %s2735_s28 }
  0x78   : > { %s234_s9 = scalar_lea.sflag [#allocation6], %s233_s0 }
  0x79   : > { %s2747_s20 = scalar_lea.vmem [#allocation5], %s2151_s23 }
  0x7a   : > { %2486 = dma.done.wait (%p3021_p4), %s234_s9, 6144  }
  0x7b   : > { %2488 = vsyncadd (%p3021_p4), %s234_s9, 4294961152  ;;  %p3022_p11 = scmp.eq.s32.totalorder %s2570_s19, 0 }
  0x7d   : > { %2490 = dma.done.wait (%p3022_p11), [#allocation6], 6144   ;;  %p3023_p13 = pmov %p3022_p11 }
  0x7e   : > { %v2520_v0 = vmov 0   ;;  %v2221_v1 = vld [vmem:[%s2747_s20 + $0x4] ss:$24 sps:$4 sm:$0xff]   ;;  %v2223_v2 = vld [vmem:[%s2747_s20] ss:$24 sps:$4 sm:$0xff]   ;;  %v2804_v39 = vld [vmem:[%s2739_s13 + $0x8] sm:$0xff]  }
  0x7f   : > { %2492 = vsyncadd (%p3023_p13), [#allocation6], 4294961152  ;;  %659 = vmatprep.mubr.bf16.mxu0 %v2520_v0  ;;  %772 = vmatprep.mubr.bf16.mxu1 %v2520_v0  ;;  %v2224_v3 = vld [vmem:[%s2747_s20 + $0xc] ss:$24 sps:$4 sm:$0xff]   ;;  %v2226_v4 = vld [vmem:[%s2747_s20 + $0x8] ss:$24 sps:$4 sm:$0xff]  }
  0x80   : > { %627 = vmatprep.subr.bf16.mxu0 %v2221_v1  ;;  %v2227_v5 = vld [vmem:[%s2747_s20 + $0x34] ss:$24 sps:$4 sm:$0xff]   ;;  %v2229_v6 = vld [vmem:[%s2747_s20 + $0x30] ss:$24 sps:$4 sm:$0xff]   ;;  %740 = vmatprep.subr.bf16.mxu1 %v2224_v3  ;;  %v2233_v9 = vld [vmem:[%s2747_s20 + $0x64] ss:$24 sps:$4 sm:$0xff]  }
  0x81   : > { %628 = vmatpush1.bf16.msra.mxu0 %v2223_v2  ;;  %v2230_v7 = vld [vmem:[%s2747_s20 + $0x3c] ss:$24 sps:$4 sm:$0xff]   ;;  %741 = vmatpush1.bf16.msra.mxu1 %v2226_v4  ;;  %v2232_v8 = vld [vmem:[%s2747_s20 + $0x38] ss:$24 sps:$4 sm:$0xff]   ;;  %v2236_v11 = vld [vmem:[%s2747_s20 + $0x6c] ss:$24 sps:$4 sm:$0xff]  }
  0x82   : > { %629 = vmatprep.subr.bf16.mxu0 %v2227_v5  ;;  %742 = vmatprep.subr.bf16.mxu1 %v2230_v7  ;;  %v2235_v10 = vld [vmem:[%s2747_s20 + $0x60] ss:$24 sps:$4 sm:$0xff]   ;;  %v2239_v12 = vld [vmem:[%s2747_s20 + $0x94] ss:$24 sps:$4 sm:$0xff]   ;;  %v2241_v15 = vld [vmem:[%s2747_s20 + $0x90] ss:$24 sps:$4 sm:$0xff]  }
  0x83   : > { %v2238_v13 = vld [vmem:[%s2747_s20 + $0x68] ss:$24 sps:$4 sm:$0xff]   ;;  %v2242_v14 = vld [vmem:[%s2747_s20 + $0x9c] ss:$24 sps:$4 sm:$0xff]   ;;  %v2244_v17 = vld [vmem:[%s2747_s20 + $0x98] ss:$24 sps:$4 sm:$0xff]  }
  0x84   : > { %v2245_v16 = vld [vmem:[%s2747_s20 + $0xc4] ss:$24 sps:$4 sm:$0xff]   ;;  %v2247_v19 = vld [vmem:[%s2747_s20 + $0xc0] ss:$24 sps:$4 sm:$0xff]   ;;  %v2251_v20 = vld [vmem:[%s2747_s20 + $0xf4] ss:$24 sps:$4 sm:$0xff]  }
  0x85   : > { %630 = vmatpush1.bf16.msra.mxu0 %v2229_v6  ;;  %743 = vmatpush1.bf16.msra.mxu1 %v2232_v8  ;;  %v2248_v18 = vld [vmem:[%s2747_s20 + $0xcc] ss:$24 sps:$4 sm:$0xff]   ;;  %v2250_v21 = vld [vmem:[%s2747_s20 + $0xc8] ss:$24 sps:$4 sm:$0xff]   ;;  %v2254_v22 = vld [vmem:[%s2747_s20 + $0xfc] ss:$24 sps:$4 sm:$0xff]  }
  0x86   : > { %631 = vmatprep.subr.bf16.mxu0 %v2233_v9  ;;  %744 = vmatprep.subr.bf16.mxu1 %v2236_v11  ;;  %v2253_v23 = vld [vmem:[%s2747_s20 + $0xf0] ss:$24 sps:$4 sm:$0xff]   ;;  %v2257_v24 = vld [vmem:[%s2747_s20 + $0x124] ss:$24 sps:$4 sm:$0xff]   ;;  %v2259_v27 = vld [vmem:[%s2747_s20 + $0x120] ss:$24 sps:$4 sm:$0xff]  }
  0x87   : > { %v2256_v25 = vld [vmem:[%s2747_s20 + $0xf8] ss:$24 sps:$4 sm:$0xff]   ;;  %v2260_v26 = vld [vmem:[%s2747_s20 + $0x12c] ss:$24 sps:$4 sm:$0xff]   ;;  %v2262_v29 = vld [vmem:[%s2747_s20 + $0x128] ss:$24 sps:$4 sm:$0xff]  }
  0x88   : > { %v2263_v28 = vld [vmem:[%s2747_s20 + $0x154] ss:$24 sps:$4 sm:$0xff]   ;;  %v2265_v31 = vld [vmem:[%s2747_s20 + $0x150] ss:$24 sps:$4 sm:$0xff]   ;;  %v2793_v34 = vld [vmem:[%s2739_s13] sm:$0xff]   ;;  %s1844_s26 = sshll.u32 %s2735_s28, 7 }
  0x89   : > { %632 = vmatpush1.bf16.msra.mxu0 %v2235_v10  ;;  %745 = vmatpush1.bf16.msra.mxu1 %v2238_v13  ;;  %v2266_v30 = vld [vmem:[%s2747_s20 + $0x15c] ss:$24 sps:$4 sm:$0xff]   ;;  %v2268_v33 = vld [vmem:[%s2747_s20 + $0x158] ss:$24 sps:$4 sm:$0xff]   ;;  %v2301_v42 = vld [vmem:[#allocation7 + $0x40] sm:$0xff]   ;;  %s2917_s29 = scalar_lea.vmem [#allocation8], %s1844_s26 }
  0x8a   : > { %633 = vmatprep.subr.bf16.mxu0 %v2239_v12  ;;  %746 = vmatprep.subr.bf16.mxu1 %v2242_v14  ;;  %v2272_v32 = vld [vmem:[%s2747_s20 + $0x14] ss:$24 sps:$4 sm:$0xff]   ;;  %v2270_v35 = vld [vmem:[%s2747_s20 + $0x10] ss:$24 sps:$4 sm:$0xff]   ;;  %v2276_v36 = vld [vmem:[%s2747_s20 + $0x44] ss:$24 sps:$4 sm:$0xff]  }
  0x8b   : > { %v2274_v37 = vld [vmem:[%s2747_s20 + $0x40] ss:$24 sps:$4 sm:$0xff]   ;;  %v2280_v38 = vld [vmem:[%s2747_s20 + $0x74] ss:$24 sps:$4 sm:$0xff]   ;;  %v2278_v40 = vld [vmem:[%s2747_s20 + $0x70] ss:$24 sps:$4 sm:$0xff]  }
  0x8c   : > { %v2284_v41 = vld [vmem:[%s2747_s20 + $0xa4] ss:$24 sps:$4 sm:$0xff]   ;;  %v2303_v44 = vld [vmem:[#allocation7 + $0x48] sm:$0xff]   ;;  %v2282_v45 = vld [vmem:[%s2747_s20 + $0xa0] ss:$24 sps:$4 sm:$0xff]   ;;  %s1956_s8 = sshll.u32 %s2570_s19, 11 }
  0x8d   : > { %634 = vmatpush1.bf16.msra.mxu0 %v2241_v15  ;;  %747 = vmatpush1.bf16.msra.mxu1 %v2244_v17  ;;  %v2302_v43 = vld [vmem:[#allocation7] sm:$0xff]   ;;  %v2813_v46 = vld [vmem:[%s2739_s13 + $0x10] sm:$0xff]   ;;  %v2304_v48 = vld [vmem:[#allocation7 + $0x8] sm:$0xff]   ;;  %s1726_s10 = sshll.u32 %s2917_s29, 4  ;;  %s2952_s6 = scalar_lea.hbm %s3005_s4, %s1956_s8  ;;  %s2954_s10 = int_to_ptr.vmem [resolvable:$true] %s1726_s10 }
  0x8e   : > { %635 = vmatprep.subr.bf16.mxu0 %v2245_v16  ;;  %748 = vmatprep.subr.bf16.mxu1 %v2248_v18  ;;  %v2288_v47 = vld [vmem:[%s2747_s20 + $0xd4] ss:$24 sps:$4 sm:$0xff]   ;;  %v2286_v50 = vld [vmem:[%s2747_s20 + $0xd0] ss:$24 sps:$4 sm:$0xff]   ;;  %v2292_v51 = vld [vmem:[%s2747_s20 + $0x104] ss:$24 sps:$4 sm:$0xff]  }
  0x8f   : > { %v2305_v49 = vld [vmem:[#allocation7 + $0x50] sm:$0xff]   ;;  %v2307_v53 = vld [vmem:[#allocation7 + $0x58] sm:$0xff]   ;;  %v2309_v58 = vld [vmem:[#allocation7 + $0x60] sm:$0xff]   ;;  %s1713_s19 = scalar_lea.sflag [#allocation4], %s2735_s28  ;;  %s2437_s2 = scalar_lea.vmem %s2954_s10, 2048 }
  0x90   : > { %v2306_v52 = vld [vmem:[#allocation7 + $0x10] sm:$0xff]   ;;  %v2290_v54 = vld [vmem:[%s2747_s20 + $0x100] ss:$24 sps:$4 sm:$0xff]   ;;  %v2300_v60 = vld [vmem:[%s2747_s20 + $0x164] ss:$24 sps:$4 sm:$0xff]   ;;  %p2438_p3 = scmp.ne.s32.totalorder %s2954_s10, %s2437_s2  ;;  %s2521_s7 = smov [#allocation8]  }
  0x91   : > { %636 = vmatpush1.bf16.msra.mxu0 %v2247_v19  ;;  %749 = vmatpush1.bf16.msra.mxu1 %v2250_v21  ;;  %v2824_v55 = vld [vmem:[%s2739_s13 + $0x18] sm:$0xff]   ;;  %v2296_v56 = vld [vmem:[%s2747_s20 + $0x134] ss:$24 sps:$4 sm:$0xff]   ;;  %v2294_v59 = vld [vmem:[%s2747_s20 + $0x130] ss:$24 sps:$4 sm:$0xff]   ;;  %s2441_s5 = sshll.u32 %s2521_s7, 4  ;;  %s2442_s5 = int_to_ptr.vmem [resolvable:$false] %s2441_s5 }
  0x92   : > { %637 = vmatprep.subr.bf16.mxu0 %v2251_v20  ;;  %750 = vmatprep.subr.bf16.mxu1 %v2254_v22  ;;  %v2308_v57 = vld [vmem:[#allocation7 + $0x18] sm:$0xff]   ;;  %v2310_v61 = vld [vmem:[#allocation7 + $0x20] sm:$0xff]   ;;  %v2315_v62 = vld [vmem:[#allocation7 + $0x68] sm:$0xff]   ;;  %p2439_p7 = pnand %p2438_p3, %p2643_p12  ;;  %s2443_s12 = scalar_lea.vmem %s2442_s5, 4096 }
  0x93   : > { %v2298_v63 = vld [vmem:[%s2747_s20 + $0x160] ss:$24 sps:$4 sm:$0xff]   ;;  %v2316_v3 = vld [vmem:[#allocation7 + $0x28] sm:$0xff]   ;;  %v2321_v4 = vld [vmem:[#allocation7 + $0x70] sm:$0xff]   ;;  %p2444_p1 = scmp.lt.s32.totalorder %s2954_s10, %s2442_s5  ;;  %p2445_p5 = scmp.lt.s32.totalorder %s2443_s12, %s2437_s2 }
  0x94   : > { %v2835_v1 = vld [vmem:[%s2739_s13 + $0x20] sm:$0xff]   ;;  %v2322_v5 = vld [vmem:[#allocation7 + $0x30] sm:$0xff]   ;;  %v2327_v6 = vld [vmem:[#allocation7 + $0x78] sm:$0xff]   ;;  %p2440_p9 = pneg %p2439_p7 }
  0x95   : > { %638 = vmatpush1.bf16.msra.mxu0 %v2253_v23  ;;  %751 = vmatpush1.bf16.msra.mxu1 %v2256_v25  ;;  %v2311_v2 = vld [vmem:[#allocation7 + $0xc0] sm:$0xff]   ;;  %v2289_v7 = vld [vmem:[%s2739_s13 + $0x28] sm:$0xff]   ;;  %v2293_v8 = vld [vmem:[%s2739_s13 + $0x30] sm:$0xff]   ;;  %p2446_p2 = por %p2445_p5, %p2444_p1 }
  0x96   : > { %639 = vmatprep.subr.bf16.mxu0 %v2257_v24  ;;  %752 = vmatprep.subr.bf16.mxu1 %v2260_v26  ;;  %v2297_v9 = vld [vmem:[%s2739_s13 + $0x38] sm:$0xff]   ;;  %v2312_v10 = vld [vmem:[#allocation7 + $0x80] sm:$0xff]   ;;  %v2313_v11 = vld [vmem:[#allocation7 + $0xc8] sm:$0xff]  }
  0x97   : > { %v2314_v12 = vld [vmem:[#allocation7 + $0x88] sm:$0xff]   ;;  %v2317_v13 = vld [vmem:[#allocation7 + $0xd0] sm:$0xff]   ;;  %v2319_v15 = vld [vmem:[#allocation7 + $0xd8] sm:$0xff]   ;;  %p2447_p6 = pnand %p2446_p2, %p2440_p9 }
  0x98   : > { %v2318_v14 = vld [vmem:[#allocation7 + $0x90] sm:$0xff]   ;;  %v2320_v16 = vld [vmem:[#allocation7 + $0x98] sm:$0xff]   ;;  %v2323_v17 = vld [vmem:[#allocation7 + $0xe0] sm:$0xff]  }
  0x99   : > { %640 = vmatpush1.bf16.msra.mxu0 %v2259_v27  ;;  %753 = vmatpush1.bf16.msra.mxu1 %v2262_v29  ;;  %v2324_v18 = vld [vmem:[#allocation7 + $0xa0] sm:$0xff]   ;;  %v2325_v19 = vld [vmem:[#allocation7 + $0xe8] sm:$0xff]   ;;  %v2329_v21 = vld [vmem:[#allocation7 + $0xf0] sm:$0xff]  }
  0x9a   : > { %641 = vmatprep.subr.bf16.mxu0 %v2263_v28  ;;  %754 = vmatprep.subr.bf16.mxu1 %v2266_v30  ;;  %v2326_v20 = vld [vmem:[#allocation7 + $0xa8] sm:$0xff]   ;;  %v2328_v22 = vld [vmem:[#allocation7 + $0x38] sm:$0xff]   ;;  %v2330_v23 = vld [vmem:[#allocation7 + $0xb0] sm:$0xff]  }
  0x9b   : > { %v2331_v24 = vld [vmem:[#allocation7 + $0xf8] sm:$0xff]   ;;  %v2333_v26 = vld [vmem:[#allocation7 + $0x140] sm:$0xff]  }
  0x9c   : > { %v2332_v25 = vld [vmem:[#allocation7 + $0xb8] sm:$0xff]  }
  0x9d   : > { %642 = vmatpush1.bf16.msra.mxu0 %v2265_v31  ;;  %755 = vmatpush1.bf16.msra.mxu1 %v2268_v33 }
  0x9e   : > { %853 = vmatprep.subr.bf16.mxu0 %v2272_v32  ;;  %1957 = vmatprep.subr.bf16.mxu1 %v2301_v42 }
  0xa0   : > { %660 = vmatmul.mubr.bf16.vlgmr.msra.gmra.mrb[0].mxu0 %v2793_v34  ;;  %773 = vmatmul.mubr.bf16.vlgmr.msra.gmra.mrb[0].mxu1 %v2793_v34 }
  0xa1   : > { %854 = vmatpush1.bf16.msra.mxu0 %v2270_v35  ;;  %669 = vmatprep.mubr.bf16.mxu0 %v2520_v0 }
  0xa2   : > { %855 = vmatprep.subr.bf16.mxu0 %v2276_v36  ;;  %782 = vmatprep.mubr.bf16.mxu1 %v2520_v0  ;;  %v2334_v36 = vld [vmem:[#allocation7 + $0x100] sm:$0xff]  }
  0xa3   : > { %1958 = vmatpush3.bf16.msra.mxu1 %v2302_v43  ;;  %v2337_v43 = vld [vmem:[#allocation7 + $0x150] sm:$0xff]  }
  0xa4   : > { %1959 = vmatprep.subr.bf16.mxu1 %v2303_v44 }
  0xa5   : > { %856 = vmatpush1.bf16.msra.mxu0 %v2274_v37 }
  0xa6   : > { %857 = vmatprep.subr.bf16.mxu0 %v2280_v38 }
  0xa7   : > { %1960 = vmatpush3.bf16.msra.mxu1 %v2304_v48 }
  0xa8   : > { %670 = vmatmul.mubr.bf16.gmra.mrb[4].mxu0 %v2804_v39  ;;  %783 = vmatmul.mubr.bf16.gmra.mrb[4].mxu1 %v2804_v39 }
  0xa9   : > { %679 = vmatprep.mubr.bf16.mxu0 %v2520_v0  ;;  %858 = vmatpush1.bf16.msra.mxu0 %v2278_v40 }
  0xaa   : > { %859 = vmatprep.subr.bf16.mxu0 %v2284_v41  ;;  %792 = vmatprep.mubr.bf16.mxu1 %v2520_v0 }
  0xab   : > { %1961 = vmatprep.subr.bf16.mxu1 %v2305_v49 }
  0xac   : > { %1962 = vmatpush3.bf16.msra.mxu1 %v2306_v52 }
  0xad   : > { %860 = vmatpush1.bf16.msra.mxu0 %v2282_v45  ;;  %1963 = vmatprep.subr.bf16.mxu1 %v2307_v53 }
  0xae   : > { %861 = vmatprep.subr.bf16.mxu0 %v2288_v47 }
  0xb0   : > { %680 = vmatmul.mubr.bf16.gmra.mrb[8].mxu0 %v2813_v46  ;;  %793 = vmatmul.mubr.bf16.gmra.mrb[8].mxu1 %v2813_v46 }
  0xb1   : > { %689 = vmatprep.mubr.bf16.mxu0 %v2520_v0  ;;  %862 = vmatpush1.bf16.msra.mxu0 %v2286_v50 }
  0xb2   : > { %863 = vmatprep.subr.bf16.mxu0 %v2292_v51  ;;  %802 = vmatprep.mubr.bf16.mxu1 %v2520_v0  ;;  %v2338_v51 = vld [vmem:[#allocation7 + $0x110] sm:$0xff]  }
  0xb3   : > { %1964 = vmatpush3.bf16.msra.mxu1 %v2308_v57  ;;  %v2340_v57 = vld [vmem:[#allocation7 + $0x118] sm:$0xff]  }
  0xb4   : > { %1965 = vmatprep.subr.bf16.mxu1 %v2309_v58 }
  0xb5   : > { %864 = vmatpush1.bf16.msra.mxu0 %v2290_v54  ;;  %v2339_v54 = vld [vmem:[#allocation7 + $0x158] sm:$0xff]  }
  0xb6   : > { %865 = vmatprep.subr.bf16.mxu0 %v2296_v56 }
  0xb7   : > { %1966 = vmatpush3.bf16.msra.mxu1 %v2310_v61 }
  0xb8   : > { %690 = vmatmul.mubr.bf16.gmra.mrb[12].mxu0 %v2824_v55  ;;  %803 = vmatmul.mubr.bf16.gmra.mrb[12].mxu1 %v2824_v55 }
  0xb9   : > { %699 = vmatprep.mubr.bf16.mxu0 %v2520_v0  ;;  %866 = vmatpush1.bf16.msra.mxu0 %v2294_v59  ;;  %v2341_v59 = vld [vmem:[#allocation7 + $0x160] sm:$0xff]  }
  0xba   : > { %867 = vmatprep.subr.bf16.mxu0 %v2300_v60  ;;  %812 = vmatprep.mubr.bf16.mxu1 %v2520_v0 }
  0xbb   : > { %1967 = vmatprep.subr.bf16.mxu1 %v2315_v62 }
  0xbc   : > { %1968 = vmatpush3.bf16.msra.mxu1 %v2316_v3 }
  0xbd   : > { %868 = vmatpush1.bf16.msra.mxu0 %v2298_v63  ;;  %1969 = vmatprep.subr.bf16.mxu1 %v2321_v4  ;;  %v2342_v4 = vld [vmem:[#allocation7 + $0x120] sm:$0xff]  }
  0xbe   : > { %2021 = vmatprep.subr.bf16.mxu0 %v2311_v2 }
  0xc0   : > { %700 = vmatmul.mubr.bf16.gmra.mrb[16].mxu0 %v2835_v1  ;;  %813 = vmatmul.mubr.bf16.gmra.mrb[16].mxu1 %v2835_v1 }
  0xc1   : > { %709 = vmatprep.mubr.bf16.mxu0 %v2520_v0  ;;  %822 = vmatprep.mubr.bf16.mxu1 %v2520_v0 }
  0xc2   : > { %1970 = vmatpush3.bf16.msra.mxu1 %v2322_v5 }
  0xc3   : > { %1971 = vmatprep.subr.bf16.mxu1 %v2327_v6 }
  0xc6   : > { %1972 = vmatpush3.bf16.msra.mxu1 %v2328_v22 }
  0xc7   : > { %2085 = vmatprep.subr.bf16.mxu1 %v2333_v26  ;;  %v2348_v26 = vld [vmem:[#allocation7 + $0x138] sm:$0xff]  }
  0xc8   : > { %710 = vmatmul.mubr.bf16.gmra.mrb[20].mxu0 %v2289_v7  ;;  %823 = vmatmul.mubr.bf16.gmra.mrb[20].mxu1 %v2289_v7 }
  0xc9   : > { %719 = vmatprep.mubr.bf16.mxu0 %v2520_v0  ;;  %832 = vmatprep.mubr.bf16.mxu1 %v2520_v0 }
  0xd0   : > { %720 = vmatmul.mubr.bf16.gmra.mrb[24].mxu0 %v2293_v8  ;;  %833 = vmatmul.mubr.bf16.gmra.mrb[24].mxu1 %v2293_v8 }
  0xd1   : > { %729 = vmatprep.mubr.bf16.mxu0 %v2520_v0  ;;  %842 = vmatprep.mubr.bf16.mxu1 %v2520_v0 }
  0xd8   : > { %730 = vmatmul.mubr.bf16.gmra.mrb[28].mxu0 %v2297_v9  ;;  %843 = vmatmul.mubr.bf16.gmra.mrb[28].mxu1 %v2297_v9 }
  0xd9   : > { %885 = vmatprep.mubr.bf16.mxu0 %v2520_v0 }
  0xe0   : > { %886 = vmatmul.mubr.bf16.vlgmr.msra.gmra.mrb[32].mxu0 %v2793_v34 }
  0xe1   : > { %895 = vmatprep.mubr.bf16.mxu0 %v2520_v0  ;;  %2022 = vmatpush3.bf16.msra.mxu0 %v2312_v10  ;;  %v2344_v10 = vld [vmem:[#allocation7 + $0x128] sm:$0xff]  }
  0xe2   : > { %2023 = vmatprep.subr.bf16.mxu0 %v2313_v11 }
  0xe5   : > { %2024 = vmatpush3.bf16.msra.mxu0 %v2314_v12  ;;  %v2345_v12 = vld [vmem:[#allocation7 + $0x170] sm:$0xff]  }
  0xe6   : > { %2025 = vmatprep.subr.bf16.mxu0 %v2317_v13 }
  0xe8   : > { %896 = vmatmul.mubr.bf16.gmra.mrb[36].mxu0 %v2804_v39  ;;  %v2335_v39 = vld [vmem:[#allocation7 + $0x148] sm:$0xff]  }
  0xe9   : > { %905 = vmatprep.mubr.bf16.mxu0 %v2520_v0  ;;  %2026 = vmatpush3.bf16.msra.mxu0 %v2318_v14 }
  0xea   : > { %2027 = vmatprep.subr.bf16.mxu0 %v2319_v15 }
  0xed   : > { %2028 = vmatpush3.bf16.msra.mxu0 %v2320_v16 }
  0xee   : > { %2029 = vmatprep.subr.bf16.mxu0 %v2323_v17 }
  0xf0   : > { %906 = vmatmul.mubr.bf16.gmra.mrb[40].mxu0 %v2813_v46 }
  0xf1   : > { %915 = vmatprep.mubr.bf16.mxu0 %v2520_v0  ;;  %2030 = vmatpush3.bf16.msra.mxu0 %v2324_v18 }
  0xf2   : > { %2031 = vmatprep.subr.bf16.mxu0 %v2325_v19 }
  0xf5   : > { %2032 = vmatpush3.bf16.msra.mxu0 %v2326_v20  ;;  %v2346_v20 = vld [vmem:[#allocation7 + $0x130] sm:$0xff]  }
  0xf6   : > { %2033 = vmatprep.subr.bf16.mxu0 %v2329_v21 }
  0xf8   : > { %916 = vmatmul.mubr.bf16.gmra.mrb[44].mxu0 %v2824_v55 }
  0xf9   : > { %925 = vmatprep.mubr.bf16.mxu0 %v2520_v0  ;;  %2034 = vmatpush3.bf16.msra.mxu0 %v2330_v23  ;;  %v2347_v23 = vld [vmem:[#allocation7 + $0x178] sm:$0xff]  }
  0xfa   : > { %2035 = vmatprep.subr.bf16.mxu0 %v2331_v24 }
  0xfd   : > { %2036 = vmatpush3.bf16.msra.mxu0 %v2332_v25 }
 0x100   : > { %926 = vmatmul.mubr.bf16.gmra.mrb[48].mxu0 %v2835_v1 }
 0x101   : > { %935 = vmatprep.mubr.bf16.mxu0 %v2520_v0 }
 0x108   : > { %936 = vmatmul.mubr.bf16.gmra.mrb[52].mxu0 %v2289_v7  ;;  %v2343_v7 = vld [vmem:[#allocation7 + $0x168] sm:$0xff]  }
 0x109   : > { %945 = vmatprep.mubr.bf16.mxu0 %v2520_v0 }
 0x110   : > { %946 = vmatmul.mubr.bf16.gmra.mrb[56].mxu0 %v2293_v8 }
 0x111   : > { %955 = vmatprep.mubr.bf16.mxu0 %v2520_v0  ;;  %v2336_v0 = vld [vmem:[#allocation7 + $0x108] sm:$0xff]  }
 0x118   : > { %956 = vmatmul.mubr.bf16.gmra.mrb[60].mxu0 %v2297_v9 }
 0x173   : > { %v661_v27 = vpop.f32.mrb[0].mxu0  ;;  %v774_v30 = vpop.f32.mrb[0].mxu1 }
 0x174   : > { %v663_v28 = vpop.f32.mrb[1].mxu0  ;;  %v776_v33 = vpop.f32.mrb[1].mxu1 }
 0x175   : > { %v665_v29 = vpop.f32.mrb[2].mxu0  ;;  %v778_v35 = vpop.f32.mrb[2].mxu1 }
 0x176   : > { %v966_v31 = vpack.c.bf16 %v665_v29, %v661_v27  ;;  %v667_v32 = vpop.f32.mrb[3].mxu0  ;;  %v968_v37 = vpack.c.bf16 %v778_v35, %v774_v30  ;;  %v780_v38 = vpop.f32.mrb[3].mxu1 }
 0x177   : > { %v967_v34 = vpack.c.bf16 %v667_v32, %v663_v28  ;;  %v969_v40 = vpack.c.bf16 %v780_v38, %v776_v33 }
 0x179   : > { %1437 = vmatprep.mubr.bf16.mxu1 %v967_v34  ;;  %1534 = vmatprep.mubr.bf16.mxu0 %v969_v40 }
 0x17a   : > { %1438 = vmatmul.mubr.bf16.vlgmr.msra.gmra.mrb[32].mxu1 %v966_v31  ;;  %1535 = vmatmul.mubr.bf16.vlgmr.msra.gmra.mrb[64].mxu0 %v968_v37 }
 0x17b   : > { %v671_v41 = vpop.f32.mrb[4].mxu0  ;;  %2086 = vmatpush3.bf16.msra.mxu1 %v2334_v36  ;;  %v784_v45 = vpop.f32.mrb[4].mxu1 }
 0x17c   : > { %v673_v42 = vpop.f32.mrb[5].mxu0  ;;  %2087 = vmatprep.subr.bf16.mxu1 %v2335_v39  ;;  %v786_v48 = vpop.f32.mrb[5].mxu1 }
 0x17d   : > { %v675_v44 = vpop.f32.mrb[6].mxu0  ;;  %v788_v50 = vpop.f32.mrb[6].mxu1 }
 0x17e   : > { %v972_v46 = vpack.c.bf16 %v675_v44, %v671_v41  ;;  %v677_v47 = vpop.f32.mrb[7].mxu0  ;;  %v974_v52 = vpack.c.bf16 %v788_v50, %v784_v45  ;;  %v790_v53 = vpop.f32.mrb[7].mxu1 }
 0x17f   : > { %v973_v49 = vpack.c.bf16 %v677_v47, %v673_v42  ;;  %2088 = vmatpush3.bf16.msra.mxu1 %v2336_v0  ;;  %v975_v55 = vpack.c.bf16 %v790_v53, %v786_v48 }
 0x180   : > { %2089 = vmatprep.subr.bf16.mxu1 %v2337_v43 }
 0x181   : > { %1445 = vmatprep.mubr.bf16.mxu1 %v973_v49  ;;  %1542 = vmatprep.mubr.bf16.mxu0 %v975_v55 }
 0x182   : > { %1446 = vmatmul.mubr.bf16.gmra.mrb[36].mxu1 %v972_v46  ;;  %1543 = vmatmul.mubr.bf16.gmra.mrb[68].mxu0 %v974_v52 }
 0x183   : > { %v681_v56 = vpop.f32.mrb[8].mxu0  ;;  %2090 = vmatpush3.bf16.msra.mxu1 %v2338_v51  ;;  %v794_v61 = vpop.f32.mrb[8].mxu1 }
 0x184   : > { %v683_v58 = vpop.f32.mrb[9].mxu0  ;;  %2091 = vmatprep.subr.bf16.mxu1 %v2339_v54  ;;  %v796_v1 = vpop.f32.mrb[9].mxu1 }
 0x185   : > { %v685_v60 = vpop.f32.mrb[10].mxu0  ;;  %v798_v3 = vpop.f32.mrb[10].mxu1 }
 0x186   : > { %v978_v62 = vpack.c.bf16 %v685_v60, %v681_v56  ;;  %v687_v63 = vpop.f32.mrb[11].mxu0  ;;  %v980_v5 = vpack.c.bf16 %v798_v3, %v794_v61  ;;  %v800_v6 = vpop.f32.mrb[11].mxu1 }
 0x187   : > { %v979_v2 = vpack.c.bf16 %v687_v63, %v683_v58  ;;  %2092 = vmatpush3.bf16.msra.mxu1 %v2340_v57  ;;  %v981_v8 = vpack.c.bf16 %v800_v6, %v796_v1 }
 0x188   : > { %2093 = vmatprep.subr.bf16.mxu1 %v2341_v59 }
 0x189   : > { %1453 = vmatprep.mubr.bf16.mxu1 %v979_v2  ;;  %1550 = vmatprep.mubr.bf16.mxu0 %v981_v8 }
 0x18a   : > { %1454 = vmatmul.mubr.bf16.gmra.mrb[40].mxu1 %v978_v62  ;;  %1551 = vmatmul.mubr.bf16.gmra.mrb[72].mxu0 %v980_v5 }
 0x18b   : > { %v691_v9 = vpop.f32.mrb[12].mxu0  ;;  %2094 = vmatpush3.bf16.msra.mxu1 %v2342_v4  ;;  %v804_v14 = vpop.f32.mrb[12].mxu1 }
 0x18c   : > { %v693_v11 = vpop.f32.mrb[13].mxu0  ;;  %2095 = vmatprep.subr.bf16.mxu1 %v2343_v7  ;;  %v806_v17 = vpop.f32.mrb[13].mxu1 }
 0x18d   : > { %v695_v13 = vpop.f32.mrb[14].mxu0  ;;  %v808_v19 = vpop.f32.mrb[14].mxu1 }
 0x18e   : > { %v984_v15 = vpack.c.bf16 %v695_v13, %v691_v9  ;;  %v697_v16 = vpop.f32.mrb[15].mxu0  ;;  %v986_v21 = vpack.c.bf16 %v808_v19, %v804_v14  ;;  %v810_v22 = vpop.f32.mrb[15].mxu1 }
 0x18f   : > { %v985_v18 = vpack.c.bf16 %v697_v16, %v693_v11  ;;  %2096 = vmatpush3.bf16.msra.mxu1 %v2344_v10  ;;  %v987_v24 = vpack.c.bf16 %v810_v22, %v806_v17 }
 0x190   : > { %2097 = vmatprep.subr.bf16.mxu1 %v2345_v12 }
 0x191   : > { %1461 = vmatprep.mubr.bf16.mxu1 %v985_v18  ;;  %1558 = vmatprep.mubr.bf16.mxu0 %v987_v24 }
 0x192   : > { %1462 = vmatmul.mubr.bf16.gmra.mrb[44].mxu1 %v984_v15  ;;  %1559 = vmatmul.mubr.bf16.gmra.mrb[76].mxu0 %v986_v21 }
 0x193   : > { %v701_v25 = vpop.f32.mrb[16].mxu0  ;;  %2098 = vmatpush3.bf16.msra.mxu1 %v2346_v20  ;;  %v814_v29 = vpop.f32.mrb[16].mxu1 }
 0x194   : > { %v703_v27 = vpop.f32.mrb[17].mxu0  ;;  %2099 = vmatprep.subr.bf16.mxu1 %v2347_v23  ;;  %v816_v32 = vpop.f32.mrb[17].mxu1 }
 0x195   : > { %v705_v28 = vpop.f32.mrb[18].mxu0  ;;  %v818_v34 = vpop.f32.mrb[18].mxu1 }
 0x196   : > { %v990_v30 = vpack.c.bf16 %v705_v28, %v701_v25  ;;  %v707_v31 = vpop.f32.mrb[19].mxu0  ;;  %v992_v35 = vpack.c.bf16 %v818_v34, %v814_v29  ;;  %v820_v36 = vpop.f32.mrb[19].mxu1 }
 0x197   : > { %v991_v33 = vpack.c.bf16 %v707_v31, %v703_v27  ;;  %2100 = vmatpush3.bf16.msra.mxu1 %v2348_v26  ;;  %v993_v37 = vpack.c.bf16 %v820_v36, %v816_v32 }
 0x199   : > { %1469 = vmatprep.mubr.bf16.mxu1 %v991_v33  ;;  %1566 = vmatprep.mubr.bf16.mxu0 %v993_v37 }
 0x19a   : > { %1470 = vmatmul.mubr.bf16.gmra.mrb[48].mxu1 %v990_v30  ;;  %1567 = vmatmul.mubr.bf16.gmra.mrb[80].mxu0 %v992_v35 }
 0x19b   : > { %v711_v38 = vpop.f32.mrb[20].mxu0  ;;  %v824_v41 = vpop.f32.mrb[20].mxu1 }
 0x19c   : > { %v713_v39 = vpop.f32.mrb[21].mxu0  ;;  %v826_v43 = vpop.f32.mrb[21].mxu1 }
 0x19d   : > { %v715_v40 = vpop.f32.mrb[22].mxu0  ;;  %v828_v45 = vpop.f32.mrb[22].mxu1 }
 0x19e   : > { %v996_v0 = vpack.c.bf16 %v715_v40, %v711_v38  ;;  %v717_v42 = vpop.f32.mrb[23].mxu0  ;;  %v998_v46 = vpack.c.bf16 %v828_v45, %v824_v41  ;;  %v830_v47 = vpop.f32.mrb[23].mxu1 }
 0x19f   : > { %v997_v44 = vpack.c.bf16 %v717_v42, %v713_v39  ;;  %v999_v48 = vpack.c.bf16 %v830_v47, %v826_v43 }
 0x1a1   : > { %1477 = vmatprep.mubr.bf16.mxu1 %v997_v44  ;;  %1574 = vmatprep.mubr.bf16.mxu0 %v999_v48 }
 0x1a2   : > { %1478 = vmatmul.mubr.bf16.gmra.mrb[52].mxu1 %v996_v0  ;;  %1575 = vmatmul.mubr.bf16.gmra.mrb[84].mxu0 %v998_v46 }
 0x1a3   : > { %v721_v49 = vpop.f32.mrb[24].mxu0  ;;  %v834_v52 = vpop.f32.mrb[24].mxu1 }
 0x1a4   : > { %v723_v50 = vpop.f32.mrb[25].mxu0  ;;  %v836_v55 = vpop.f32.mrb[25].mxu1 }
 0x1a5   : > { %v725_v51 = vpop.f32.mrb[26].mxu0  ;;  %v838_v57 = vpop.f32.mrb[26].mxu1 }
 0x1a6   : > { %v1002_v53 = vpack.c.bf16 %v725_v51, %v721_v49  ;;  %v727_v54 = vpop.f32.mrb[27].mxu0  ;;  %v1004_v58 = vpack.c.bf16 %v838_v57, %v834_v52  ;;  %v840_v59 = vpop.f32.mrb[27].mxu1 }
 0x1a7   : > { %v1003_v56 = vpack.c.bf16 %v727_v54, %v723_v50  ;;  %v1005_v60 = vpack.c.bf16 %v840_v59, %v836_v55 }
 0x1a9   : > { %1485 = vmatprep.mubr.bf16.mxu1 %v1003_v56  ;;  %1582 = vmatprep.mubr.bf16.mxu0 %v1005_v60 }
 0x1aa   : > { %1486 = vmatmul.mubr.bf16.gmra.mrb[56].mxu1 %v1002_v53  ;;  %1583 = vmatmul.mubr.bf16.gmra.mrb[88].mxu0 %v1004_v58  ;;  %v2865_v58 = vld [vmem:[%s3004_s3] ss:$0 sm:$0xff] }
 0x1ab   : > { %v731_v61 = vpop.f32.mrb[28].mxu0  ;;  %v844_v1 = vpop.f32.mrb[28].mxu1 }
 0x1ac   : > { %v733_v62 = vpop.f32.mrb[29].mxu0  ;;  %v846_v4 = vpop.f32.mrb[29].mxu1 }
 0x1ad   : > { %v735_v63 = vpop.f32.mrb[30].mxu0  ;;  %v848_v6 = vpop.f32.mrb[30].mxu1 }
 0x1ae   : > { %v1008_v2 = vpack.c.bf16 %v735_v63, %v731_v61  ;;  %v737_v3 = vpop.f32.mrb[31].mxu0  ;;  %v1010_v7 = vpack.c.bf16 %v848_v6, %v844_v1  ;;  %v850_v8 = vpop.f32.mrb[31].mxu1 }
 0x1af   : > { %v1009_v5 = vpack.c.bf16 %v737_v3, %v733_v62  ;;  %v1011_v9 = vpack.c.bf16 %v850_v8, %v846_v4 }
 0x1b1   : > { %1493 = vmatprep.mubr.bf16.mxu1 %v1009_v5  ;;  %1590 = vmatprep.mubr.bf16.mxu0 %v1011_v9 }
 0x1b2   : > { %1494 = vmatmul.mubr.bf16.gmra.mrb[60].mxu1 %v1008_v2  ;;  %1591 = vmatmul.mubr.bf16.gmra.mrb[92].mxu0 %v1010_v7 }
 0x1b3   : > { %v887_v10 = vpop.f32.mrb[32].mxu0 }
 0x1b4   : > { %v889_v11 = vpop.f32.mrb[33].mxu0 }
 0x1b5   : > { %v891_v12 = vpop.f32.mrb[34].mxu0 }
 0x1b6   : > { %v970_v13 = vpack.c.bf16 %v891_v12, %v887_v10  ;;  %v893_v14 = vpop.f32.mrb[35].mxu0 }
 0x1b7   : > { %v971_v15 = vpack.c.bf16 %v893_v14, %v889_v11 }
 0x1b9   : > { %1631 = vmatprep.mubr.bf16.mxu1 %v971_v15 }
 0x1ba   : > { %1632 = vmatmul.mubr.bf16.vlgmr.msra.gmra.mrb[64].mxu1 %v970_v13 }
 0x1bb   : > { %v897_v16 = vpop.f32.mrb[36].mxu0 }
 0x1bc   : > { %v899_v17 = vpop.f32.mrb[37].mxu0 }
 0x1bd   : > { %v901_v18 = vpop.f32.mrb[38].mxu0 }
 0x1be   : > { %v976_v19 = vpack.c.bf16 %v901_v18, %v897_v16  ;;  %v903_v20 = vpop.f32.mrb[39].mxu0 }
 0x1bf   : > { %v977_v21 = vpack.c.bf16 %v903_v20, %v899_v17 }
 0x1c1   : > { %1639 = vmatprep.mubr.bf16.mxu1 %v977_v21 }
 0x1c2   : > { %1640 = vmatmul.mubr.bf16.gmra.mrb[68].mxu1 %v976_v19 }
 0x1c3   : > { %v907_v22 = vpop.f32.mrb[40].mxu0 }
 0x1c4   : > { %v909_v23 = vpop.f32.mrb[41].mxu0 }
 0x1c5   : > { %v911_v24 = vpop.f32.mrb[42].mxu0 }
 0x1c6   : > { %v982_v25 = vpack.c.bf16 %v911_v24, %v907_v22  ;;  %v913_v26 = vpop.f32.mrb[43].mxu0 }
 0x1c7   : > { %v983_v27 = vpack.c.bf16 %v913_v26, %v909_v23 }
 0x1c9   : > { %1647 = vmatprep.mubr.bf16.mxu1 %v983_v27 }
 0x1ca   : > { %1648 = vmatmul.mubr.bf16.gmra.mrb[72].mxu1 %v982_v25 }
 0x1cb   : > { %v917_v28 = vpop.f32.mrb[44].mxu0 }
 0x1cc   : > { %v919_v29 = vpop.f32.mrb[45].mxu0 }
 0x1cd   : > { %v921_v30 = vpop.f32.mrb[46].mxu0 }
 0x1ce   : > { %v988_v31 = vpack.c.bf16 %v921_v30, %v917_v28  ;;  %v923_v32 = vpop.f32.mrb[47].mxu0 }
 0x1cf   : > { %v989_v33 = vpack.c.bf16 %v923_v32, %v919_v29 }
 0x1d1   : > { %1655 = vmatprep.mubr.bf16.mxu1 %v989_v33 }
 0x1d2   : > { %1656 = vmatmul.mubr.bf16.gmra.mrb[76].mxu1 %v988_v31 }
 0x1d3   : > { %v927_v34 = vpop.f32.mrb[48].mxu0 }
 0x1d4   : > { %v929_v35 = vpop.f32.mrb[49].mxu0 }
 0x1d5   : > { %v931_v36 = vpop.f32.mrb[50].mxu0 }
 0x1d6   : > { %v994_v37 = vpack.c.bf16 %v931_v36, %v927_v34  ;;  %v933_v38 = vpop.f32.mrb[51].mxu0 }
 0x1d7   : > { %v995_v39 = vpack.c.bf16 %v933_v38, %v929_v35 }
 0x1d9   : > { %1663 = vmatprep.mubr.bf16.mxu1 %v995_v39 }
 0x1da   : > { %1664 = vmatmul.mubr.bf16.gmra.mrb[80].mxu1 %v994_v37 }
 0x1db   : > { %v937_v40 = vpop.f32.mrb[52].mxu0 }
 0x1dc   : > { %v939_v41 = vpop.f32.mrb[53].mxu0 }
 0x1dd   : > { %v941_v0 = vpop.f32.mrb[54].mxu0 }
 0x1de   : > { %v1000_v42 = vpack.c.bf16 %v941_v0, %v937_v40  ;;  %v943_v43 = vpop.f32.mrb[55].mxu0 }
 0x1df   : > { %v1001_v44 = vpack.c.bf16 %v943_v43, %v939_v41 }
 0x1e1   : > { %1671 = vmatprep.mubr.bf16.mxu1 %v1001_v44 }
 0x1e2   : > { %1672 = vmatmul.mubr.bf16.gmra.mrb[84].mxu1 %v1000_v42 }
 0x1e3   : > { %v947_v45 = vpop.f32.mrb[56].mxu0 }
 0x1e4   : > { %v949_v46 = vpop.f32.mrb[57].mxu0 }
 0x1e5   : > { %v951_v47 = vpop.f32.mrb[58].mxu0 }
 0x1e6   : > { %v1006_v48 = vpack.c.bf16 %v951_v47, %v947_v45  ;;  %v953_v49 = vpop.f32.mrb[59].mxu0 }
 0x1e7   : > { %v1007_v50 = vpack.c.bf16 %v953_v49, %v949_v46 }
 0x1e9   : > { %1679 = vmatprep.mubr.bf16.mxu1 %v1007_v50 }
 0x1ea   : > { %1680 = vmatmul.mubr.bf16.gmra.mrb[88].mxu1 %v1006_v48 }
 0x1eb   : > { %v957_v51 = vpop.f32.mrb[60].mxu0 }
 0x1ec   : > { %v959_v52 = vpop.f32.mrb[61].mxu0 }
 0x1ed   : > { %v961_v53 = vpop.f32.mrb[62].mxu0 }
 0x1ee   : > { %v1012_v54 = vpack.c.bf16 %v961_v53, %v957_v51  ;;  %v963_v55 = vpop.f32.mrb[63].mxu0 }
 0x1ef   : > { %v1013_v56 = vpack.c.bf16 %v963_v55, %v959_v52 }
 0x1f1   : > { %1687 = vmatprep.mubr.bf16.mxu1 %v1013_v56 }
 0x1f2   : > { %1688 = vmatmul.mubr.bf16.gmra.mrb[92].mxu1 %v1012_v54 }
 0x24d   : > { %v1973_v57 = vpop.f32.mrb[32].mxu1  ;;  %v2037_v62 = vpop.f32.mrb[64].mxu0 }
 0x24e   : > { %v1974_v59 = vpop.f32.mrb[33].mxu1  ;;  %v2038_v1 = vpop.f32.mrb[65].mxu0 }
 0x24f   : > { %v1975_v60 = vadd.f32 %v1974_v59, %v1973_v57  ;;  %v1976_v61 = vpop.f32.mrb[34].mxu1  ;;  %v2039_v4 = vadd.f32 %v2038_v1, %v2037_v62  ;;  %v2040_v5 = vpop.f32.mrb[66].mxu0 }
 0x250   : > { %v1977_v63 = vpop.f32.mrb[35].mxu1  ;;  %v2041_v6 = vpop.f32.mrb[67].mxu0 }
 0x251   : > { %v1440_v2 = vadd.f32 %v1975_v60, %v2865_v58  ;;  %v1978_v3 = vadd.f32 %v1977_v63, %v1976_v61  ;;  %v2042_v9 = vadd.f32 %v2041_v6, %v2040_v5 }
 0x253   : > { %v1443_v7 = vadd.f32 %v1978_v3, %v2865_v58  ;;  %v2869_v8 = vadd.f32 %v2039_v4, %v1440_v2 }
 0x255   : > { %v2871_v10 = vadd.f32 %v2042_v9, %v1443_v7  ;;  %v1979_v11 = vpop.f32.mrb[36].mxu1  ;;  %v2043_v15 = vpop.f32.mrb[68].mxu0 }
 0x256   : > { %v1980_v12 = vpop.f32.mrb[37].mxu1  ;;  %v2044_v17 = vpop.f32.mrb[69].mxu0 }
 0x257   : > { %v1981_v13 = vadd.f32 %v1980_v12, %v1979_v11  ;;  %v1982_v14 = vpop.f32.mrb[38].mxu1  ;;  %v2045_v20 = vadd.f32 %v2044_v17, %v2043_v15  ;;  %v2046_v21 = vpop.f32.mrb[70].mxu0 }
 0x258   : > { %v1983_v16 = vpop.f32.mrb[39].mxu1  ;;  %v2047_v22 = vpop.f32.mrb[71].mxu0 }
 0x259   : > { %v1448_v18 = vadd.f32 %v1981_v13, %v2865_v58  ;;  %v1984_v19 = vadd.f32 %v1983_v16, %v1982_v14  ;;  %v2048_v25 = vadd.f32 %v2047_v22, %v2046_v21 }
 0x25b   : > { %v1451_v23 = vadd.f32 %v1984_v19, %v2865_v58  ;;  %v2875_v24 = vadd.f32 %v2045_v20, %v1448_v18 }
 0x25d   : > { %v2877_v26 = vadd.f32 %v2048_v25, %v1451_v23  ;;  %v1985_v27 = vpop.f32.mrb[40].mxu1  ;;  %v2049_v31 = vpop.f32.mrb[72].mxu0 }
 0x25e   : > { %v1986_v28 = vpop.f32.mrb[41].mxu1  ;;  %v2050_v33 = vpop.f32.mrb[73].mxu0 }
 0x25f   : > { %v1987_v29 = vadd.f32 %v1986_v28, %v1985_v27  ;;  %v1988_v30 = vpop.f32.mrb[42].mxu1  ;;  %v2051_v36 = vadd.f32 %v2050_v33, %v2049_v31  ;;  %v2052_v37 = vpop.f32.mrb[74].mxu0 }
 0x260   : > { %v1989_v32 = vpop.f32.mrb[43].mxu1  ;;  %v2053_v38 = vpop.f32.mrb[75].mxu0 }
 0x261   : > { %v1456_v34 = vadd.f32 %v1987_v29, %v2865_v58  ;;  %v1990_v35 = vadd.f32 %v1989_v32, %v1988_v30  ;;  %v2054_v41 = vadd.f32 %v2053_v38, %v2052_v37 }
 0x263   : > { %v1459_v39 = vadd.f32 %v1990_v35, %v2865_v58  ;;  %v2881_v40 = vadd.f32 %v2051_v36, %v1456_v34 }
 0x265   : > { %v2883_v0 = vadd.f32 %v2054_v41, %v1459_v39  ;;  %v1991_v42 = vpop.f32.mrb[44].mxu1  ;;  %v2055_v46 = vpop.f32.mrb[76].mxu0 }
 0x266   : > { %v1992_v43 = vpop.f32.mrb[45].mxu1  ;;  %v2056_v48 = vpop.f32.mrb[77].mxu0 }
 0x267   : > { %v1993_v44 = vadd.f32 %v1992_v43, %v1991_v42  ;;  %v1994_v45 = vpop.f32.mrb[46].mxu1  ;;  %v2057_v51 = vadd.f32 %v2056_v48, %v2055_v46  ;;  %v2058_v52 = vpop.f32.mrb[78].mxu0 }
 0x268   : > { %v1995_v47 = vpop.f32.mrb[47].mxu1  ;;  %v2059_v53 = vpop.f32.mrb[79].mxu0 }
 0x269   : > { %v1464_v49 = vadd.f32 %v1993_v44, %v2865_v58  ;;  %v1996_v50 = vadd.f32 %v1995_v47, %v1994_v45  ;;  %v2060_v56 = vadd.f32 %v2059_v53, %v2058_v52 }
 0x26b   : > { %v1467_v54 = vadd.f32 %v1996_v50, %v2865_v58  ;;  %v2887_v55 = vadd.f32 %v2057_v51, %v1464_v49 }
 0x26d   : > { %v2889_v57 = vadd.f32 %v2060_v56, %v1467_v54  ;;  %v1997_v59 = vpop.f32.mrb[48].mxu1  ;;  %v2061_v63 = vpop.f32.mrb[80].mxu0 }
 0x26e   : > { %v1998_v60 = vpop.f32.mrb[49].mxu1  ;;  %v2062_v2 = vpop.f32.mrb[81].mxu0 }
 0x26f   : > { %v1999_v61 = vadd.f32 %v1998_v60, %v1997_v59  ;;  %v2000_v62 = vpop.f32.mrb[50].mxu1  ;;  %v2063_v5 = vadd.f32 %v2062_v2, %v2061_v63  ;;  %v2064_v6 = vpop.f32.mrb[82].mxu0 }
 0x270   : > { %v2001_v1 = vpop.f32.mrb[51].mxu1  ;;  %v2065_v7 = vpop.f32.mrb[83].mxu0 }
 0x271   : > { %v1472_v3 = vadd.f32 %v1999_v61, %v2865_v58  ;;  %v2002_v4 = vadd.f32 %v2001_v1, %v2000_v62  ;;  %v2066_v12 = vadd.f32 %v2065_v7, %v2064_v6 }
 0x273   : > { %v1475_v9 = vadd.f32 %v2002_v4, %v2865_v58  ;;  %v2893_v11 = vadd.f32 %v2063_v5, %v1472_v3 }
 0x275   : > { %v2895_v13 = vadd.f32 %v2066_v12, %v1475_v9  ;;  %v2003_v14 = vpop.f32.mrb[52].mxu1  ;;  %v2067_v18 = vpop.f32.mrb[84].mxu0 }
 0x276   : > { %v2004_v15 = vpop.f32.mrb[53].mxu1  ;;  %v2068_v20 = vpop.f32.mrb[85].mxu0 }
 0x277   : > { %v2005_v16 = vadd.f32 %v2004_v15, %v2003_v14  ;;  %v2006_v17 = vpop.f32.mrb[54].mxu1  ;;  %v2069_v23 = vadd.f32 %v2068_v20, %v2067_v18  ;;  %v2070_v25 = vpop.f32.mrb[86].mxu0 }
 0x278   : > { %v2007_v19 = vpop.f32.mrb[55].mxu1  ;;  %v2071_v27 = vpop.f32.mrb[87].mxu0 }
 0x279   : > { %v1480_v21 = vadd.f32 %v2005_v16, %v2865_v58  ;;  %v2008_v22 = vadd.f32 %v2007_v19, %v2006_v17  ;;  %v2072_v30 = vadd.f32 %v2071_v27, %v2070_v25 }
 0x27b   : > { %v1483_v28 = vadd.f32 %v2008_v22, %v2865_v58  ;;  %v2899_v29 = vadd.f32 %v2069_v23, %v1480_v21 }
 0x27d   : > { %v2901_v31 = vadd.f32 %v2072_v30, %v1483_v28  ;;  %v2009_v32 = vpop.f32.mrb[56].mxu1  ;;  %v2073_v36 = vpop.f32.mrb[88].mxu0 }
 0x27e   : > { %v2010_v33 = vpop.f32.mrb[57].mxu1  ;;  %v2074_v38 = vpop.f32.mrb[89].mxu0 }
 0x27f   : > { %v2011_v34 = vadd.f32 %v2010_v33, %v2009_v32  ;;  %v2012_v35 = vpop.f32.mrb[58].mxu1  ;;  %v2075_v42 = vadd.f32 %v2074_v38, %v2073_v36  ;;  %v2076_v43 = vpop.f32.mrb[90].mxu0 }
 0x280   : > { %v2013_v37 = vpop.f32.mrb[59].mxu1  ;;  %v2077_v44 = vpop.f32.mrb[91].mxu0 }
 0x281   : > { %v1488_v39 = vadd.f32 %v2011_v34, %v2865_v58  ;;  %v2014_v41 = vadd.f32 %v2013_v37, %v2012_v35  ;;  %v2078_v47 = vadd.f32 %v2077_v44, %v2076_v43 }
 0x283   : > { %v1491_v45 = vadd.f32 %v2014_v41, %v2865_v58  ;;  %v2905_v46 = vadd.f32 %v2075_v42, %v1488_v39 }
 0x285   : > { %v2907_v48 = vadd.f32 %v2078_v47, %v1491_v45  ;;  %v2015_v49 = vpop.f32.mrb[60].mxu1  ;;  %v2079_v53 = vpop.f32.mrb[92].mxu0 }
 0x286   : > { %v2016_v50 = vpop.f32.mrb[61].mxu1  ;;  %v2080_v56 = vpop.f32.mrb[93].mxu0 }
 0x287   : > { %v2017_v51 = vadd.f32 %v2016_v50, %v2015_v49  ;;  %v2018_v52 = vpop.f32.mrb[62].mxu1  ;;  %v2081_v61 = vadd.f32 %v2080_v56, %v2079_v53  ;;  %v2082_v62 = vpop.f32.mrb[94].mxu0 }
 0x288   : > { %v2019_v54 = vpop.f32.mrb[63].mxu1  ;;  %v2083_v63 = vpop.f32.mrb[95].mxu0 }
 0x289   : > { %v1496_v59 = vadd.f32 %v2017_v51, %v2865_v58  ;;  %v2020_v60 = vadd.f32 %v2019_v54, %v2018_v52  ;;  %v2084_v3 = vadd.f32 %v2083_v63, %v2082_v62 }
 0x28b   : > { %v1499_v1 = vadd.f32 %v2020_v60, %v2865_v58  ;;  %v2911_v2 = vadd.f32 %v2081_v61, %v1496_v59 }
 0x28d   : > { %v2913_v4 = vadd.f32 %v2084_v3, %v1499_v1  ;;  %v2101_v5 = vpop.f32.mrb[64].mxu1 }
 0x28e   : > { %v2102_v6 = vpop.f32.mrb[65].mxu1 }
 0x28f   : > { %v2103_v7 = vadd.f32 %v2102_v6, %v2101_v5  ;;  %v2104_v9 = vpop.f32.mrb[66].mxu1 }
 0x290   : > { %v2105_v12 = vpop.f32.mrb[67].mxu1 }
 0x291   : > { %v1634_v14 = vadd.f32 %v2103_v7, %v2869_v8  ;;  %v2106_v15 = vadd.f32 %v2105_v12, %v2104_v9 }
 0x293   : > { %1696 = vst [vmem:[%s2917_s29] sm:$0xff] %v1634_v14  ;;  %v1637_v58 = vadd.f32 %v2106_v15, %v2871_v10 }
 0x295   : > { %1697 = vst [vmem:[%s2917_s29 + $0x8] sm:$0xff] %v1637_v58  ;;  %v2107_v16 = vpop.f32.mrb[68].mxu1 }
 0x296   : > { %v2108_v17 = vpop.f32.mrb[69].mxu1 }
 0x297   : > { %v2109_v18 = vadd.f32 %v2108_v17, %v2107_v16  ;;  %v2110_v19 = vpop.f32.mrb[70].mxu1 }
 0x298   : > { %v2111_v20 = vpop.f32.mrb[71].mxu1 }
 0x299   : > { %v1642_v8 = vadd.f32 %v2109_v18, %v2875_v24  ;;  %v2112_v21 = vadd.f32 %v2111_v20, %v2110_v19 }
 0x29b   : > { %1698 = vst [vmem:[%s2917_s29 + $0x10] sm:$0xff] %v1642_v8  ;;  %v1645_v22 = vadd.f32 %v2112_v21, %v2877_v26 }
 0x29d   : > { %1699 = vst [vmem:[%s2917_s29 + $0x18] sm:$0xff] %v1645_v22  ;;  %v2113_v23 = vpop.f32.mrb[72].mxu1 }
 0x29e   : > { %v2114_v25 = vpop.f32.mrb[73].mxu1 }
 0x29f   : > { %v2115_v27 = vadd.f32 %v2114_v25, %v2113_v23  ;;  %v2116_v10 = vpop.f32.mrb[74].mxu1 }
 0x2a0   : > { %v2117_v28 = vpop.f32.mrb[75].mxu1 }
 0x2a1   : > { %v1650_v30 = vadd.f32 %v2115_v27, %v2881_v40  ;;  %v2118_v32 = vadd.f32 %v2117_v28, %v2116_v10 }
 0x2a3   : > { %1700 = vst [vmem:[%s2917_s29 + $0x20] sm:$0xff] %v1650_v30  ;;  %v1653_v33 = vadd.f32 %v2118_v32, %v2883_v0 }
 0x2a5   : > { %1701 = vst [vmem:[%s2917_s29 + $0x28] sm:$0xff] %v1653_v33  ;;  %v2119_v24 = vpop.f32.mrb[76].mxu1 }
 0x2a6   : > { %v2120_v34 = vpop.f32.mrb[77].mxu1 }
 0x2a7   : > { %v2121_v35 = vadd.f32 %v2120_v34, %v2119_v24  ;;  %v2122_v26 = vpop.f32.mrb[78].mxu1 }
 0x2a8   : > { %v2123_v36 = vpop.f32.mrb[79].mxu1 }
 0x2a9   : > { %v1658_v37 = vadd.f32 %v2121_v35, %v2887_v55  ;;  %v2124_v38 = vadd.f32 %v2123_v36, %v2122_v26 }
 0x2ab   : > { %1702 = vst [vmem:[%s2917_s29 + $0x30] sm:$0xff] %v1658_v37  ;;  %v1661_v39 = vadd.f32 %v2124_v38, %v2889_v57 }
 0x2ad   : > { %1703 = vst [vmem:[%s2917_s29 + $0x38] sm:$0xff] %v1661_v39  ;;  %v2125_v40 = vpop.f32.mrb[80].mxu1 }
 0x2ae   : > { %v2126_v41 = vpop.f32.mrb[81].mxu1 }
 0x2af   : > { %v2127_v42 = vadd.f32 %v2126_v41, %v2125_v40  ;;  %v2128_v0 = vpop.f32.mrb[82].mxu1 }
 0x2b0   : > { %v2129_v43 = vpop.f32.mrb[83].mxu1 }
 0x2b1   : > { %v1666_v44 = vadd.f32 %v2127_v42, %v2893_v11  ;;  %v2130_v45 = vadd.f32 %v2129_v43, %v2128_v0 }
 0x2b3   : > { %1704 = vst [vmem:[%s2917_s29 + $0x40] sm:$0xff] %v1666_v44  ;;  %v1669_v47 = vadd.f32 %v2130_v45, %v2895_v13 }
 0x2b5   : > { %1705 = vst [vmem:[%s2917_s29 + $0x48] sm:$0xff] %v1669_v47  ;;  %v2131_v55 = vpop.f32.mrb[84].mxu1 }
 0x2b6   : > { %v2132_v49 = vpop.f32.mrb[85].mxu1 }
 0x2b7   : > { %v2133_v50 = vadd.f32 %v2132_v49, %v2131_v55  ;;  %v2134_v57 = vpop.f32.mrb[86].mxu1 }
 0x2b8   : > { %v2135_v51 = vpop.f32.mrb[87].mxu1 }
 0x2b9   : > { %v1674_v52 = vadd.f32 %v2133_v50, %v2899_v29  ;;  %v2136_v53 = vadd.f32 %v2135_v51, %v2134_v57 }
 0x2bb   : > { %1706 = vst [vmem:[%s2917_s29 + $0x50] sm:$0xff] %v1674_v52  ;;  %v1677_v54 = vadd.f32 %v2136_v53, %v2901_v31 }
 0x2bd   : > { %1707 = vst [vmem:[%s2917_s29 + $0x58] sm:$0xff] %v1677_v54  ;;  %v2137_v11 = vpop.f32.mrb[88].mxu1 }
 0x2be   : > { %v2138_v56 = vpop.f32.mrb[89].mxu1 }
 0x2bf   : > { %v2139_v13 = vadd.f32 %v2138_v56, %v2137_v11  ;;  %v2140_v59 = vpop.f32.mrb[90].mxu1 }
 0x2c0   : > { %v2141_v60 = vpop.f32.mrb[91].mxu1 }
 0x2c1   : > { %v1682_v61 = vadd.f32 %v2139_v13, %v2905_v46  ;;  %v2142_v62 = vadd.f32 %v2141_v60, %v2140_v59 }
 0x2c3   : > { %1708 = vst [vmem:[%s2917_s29 + $0x60] sm:$0xff] %v1682_v61  ;;  %v1685_v29 = vadd.f32 %v2142_v62, %v2907_v48 }
 0x2c5   : > { %1709 = vst [vmem:[%s2917_s29 + $0x68] sm:$0xff] %v1685_v29  ;;  %v2143_v63 = vpop.f32.mrb[92].mxu1 }
 0x2c6   : > { %v2144_v31 = vpop.f32.mrb[93].mxu1 }
 0x2c7   : > { %v2145_v1 = vadd.f32 %v2144_v31, %v2143_v63  ;;  %v2146_v3 = vpop.f32.mrb[94].mxu1 }
 0x2c8   : > { %v2147_v5 = vpop.f32.mrb[95].mxu1 }
 0x2c9   : > { %v1690_v6 = vadd.f32 %v2145_v1, %v2911_v2  ;;  %v2148_v7 = vadd.f32 %v2147_v5, %v2146_v3 }
 0x2cb   : > { %1710 = vst [vmem:[%s2917_s29 + $0x70] sm:$0xff] %v1690_v6  ;;  %v1693_v46 = vadd.f32 %v2148_v7, %v2913_v4 }
 0x2cd   : > { %1711 = vst [vmem:[%s2917_s29 + $0x78] sm:$0xff] %v1693_v46 }
 0x2ce   : > { %2450 = shalt.err (!%p2447_p6)
}
 0x2cf   : > { %s2451_s13 = scalar_lea.hbm %s2952_s6, 2048  ;;  %s2455_s9 = scalar_lea.hbm %s3005_s4, 4096 }
 0x2d0   : > { %p2452_p8 = scmp.ne.s32.totalorder %s2952_s6, %s2451_s13  ;;  %p2456_p4 = scmp.lt.u32.totalorder %s2952_s6, %s3005_s4 }
 0x2d1   : > { %p2457_p11 = scmp.lt.u32.totalorder %s2455_s9, %s2451_s13  ;;  %p2459_p3 = scmp.lt.u32.totalorder %s2451_s13, %s2952_s6 }
 0x2d2   : > { %p2453_p10 = pnand %p2452_p8, %p2643_p12 }
 0x2d3   : > { %p2458_p13 = por %p2457_p11, %p2456_p4 }
 0x2d4   : > { %p2454_p0 = pneg %p2453_p10 }
 0x2d5   : > { %p2460_p7 = por %p2459_p3, %p2458_p13 }
 0x2d7   : > { %p2461_p9 = pnand %p2460_p7, %p2454_p0 }
 0x2d9   : > { %2464 = shalt.err (!%p2461_p9)
}
 0x2da   : > { %s2522_s25 = smov 128   ;;  %s2523_s26 = smov 8  }
 0x2db   : > { %2160 = dma.vmem_to_hbm [thread:$0]  (%p2643_p12), %s2954_s10, 2048, %s2952_s6, %s1713_s19, %s2522_s25, %s2522_s25, %s2523_s26  }
 0x2dc PF: > { %s1741_s29 = sand.u32 1, %s2499_s15   ;;  %p3024_p1 = scmp.ne.s32.totalorder %s3012_s22, 0 }
 0x2dd   : > { %p3025_p5 = scmp.ge.s32.totalorder %s2511_s18, 2  ;;  %s1742_s8 = scalar_lea.sflag [#allocation4], %s1741_s29 }
 0x2df   : > { %p2174_p2 = pnand %p3025_p5, %p3024_p1 }
 0x2e1   : > { %2494 = dma.done.wait (!%p2174_p2), %s1742_s8, 2048  }
 0x2e2   : > { %2496 = vsyncadd (!%p2174_p2), %s1742_s8, 4294965248  ;;  %p20_p6 = scmp.ge.s32.totalorder %s2605_s27, 4   ;;  %s3026_s15 = smov %s2503_s16 }
 0x2e3   : > { %s3027_s16 = smov %s2507_s17  ;;  %s3028_s17 = smov %s2639_s24 }
 0x2e4   : > { %s3029_s18 = smov %s2605_s27  ;;  %22 = sbr.rel (!%p20_p6) target bundleno = 10 (0xa), region = 98 }
 0x2eb   :  { %1747 = vsyncpa [#allocation3], 1 }
 0x2ec   :  { %1749 = vsyncpa [#allocation3 + $0x1], 1 }
 0x2ed   :  { %1750 = vsyncpa [#allocation6], 1 }
 0x2ee   :  { %1752 = vsyncpa [#allocation6 + $0x1], 1 }
 0x2ef   :  { %1753 = vsyncpa [#allocation4], 1 }
 0x2f0   :  { %1755 = vsyncpa [#allocation4 + $0x1], 1 }

</bundles_post_ra>
